<compile_context>
chip_gen: v5e
topology: v5e:2x2
jax: 0.10.0
libtpu: 0.0.40
codegen_flags: <defaults>
</compile_context>

<pallas_src>
import functools

import jax
import jax.numpy as jnp
from jax.experimental import pallas as pl
from jax.experimental.pallas import tpu as pltpu


def _relu(x):
    return jnp.maximum(x, 0.0)


def _sigmoid(x):
    # exp on the EUP + approx reciprocal on the EUP -> no VALU Newton divide.
    return pl.reciprocal(1.0 + jnp.exp(-x), approx=True)


_ACTIVATIONS = {"relu": _relu, "sigmoid": _sigmoid}


def _round_up(n, m):
    return ((n + m - 1) // m) * m


def _mlp_kernel(x_ref, *refs, n_linear, activation):
    """Fused MLP body: (Linear -> act) * (n_linear - 1) -> Linear."""
    o_ref = refs[-1]
    wb_refs = refs[:-1]          # alternating (w, b), all VMEM-resident
    act = _ACTIVATIONS[activation]

    h = x_ref[...]               # (TB, d_in) bf16
    for li in range(n_linear):
        w = wb_refs[2 * li][...]       # (d_in, d_out) bf16
        b = wb_refs[2 * li + 1][...]   # (1, d_out) f32
        h = jnp.dot(h, w, preferred_element_type=jnp.float32) + b
        if li < n_linear - 1:
            # activation in f32, back to bf16 to feed the next MXU pass
            h = act(h).astype(jnp.bfloat16)
    o_ref[...] = h.astype(o_ref.dtype)


def mlp_forward(x, params, *, activation="relu", block_b=1024):
    """Forward pass of MyFullyConnectedNN.

    x:      (B, num_channels[0]) float32
    params: list of (W, b) with PyTorch nn.Linear convention
            W: (out_features, in_features), b: (out_features,)
    """
    n_linear = len(params)
    B, d_in = x.shape
    num_classes = params[-1][0].shape[0]

    # --- glue: dtype + layout prep (not the hot path) -----------------------
    # Pre-transpose to (in, out) so the kernel runs lane-dense x @ W on the MXU.
    ws = [jnp.asarray(W).T.astype(jnp.bfloat16) for W, _ in params]
    bs = [jnp.asarray(b)[None, :].astype(jnp.float32) for _, b in params]
    x_bf16 = x.astype(jnp.bfloat16)

    # Batch tile: >=512 rows is at the HBM-roofline plateau; cap at `block_b`
    # (1024) so the double-buffered x tile stays tiny vs. v7x's 64 MiB VMEM.
    tb = min(block_b, _round_up(B, 8))
    b_pad = _round_up(B, tb)
    if b_pad != B:
        x_bf16 = jnp.pad(x_bf16, ((0, b_pad - B), (0, 0)))

    grid = (b_pad // tb,)

    in_specs = [pl.BlockSpec((tb, d_in), lambda i: (i, 0))]
    for w, b in zip(ws, bs):
        # Constant index_map -> weights/biases DMA'd once, resident across the grid.
        in_specs.append(pl.BlockSpec(w.shape, lambda i: (0, 0)))
        in_specs.append(pl.BlockSpec(b.shape, lambda i: (0, 0)))

    out_specs = pl.BlockSpec((tb, num_classes), lambda i: (i, 0))
    # TODO(synk): if a bundle profile shows masked vst store-slot stalls, pad the
    # final layer to 128 output lanes and slice [:, :num_classes] in the wrapper.

    kernel = functools.partial(_mlp_kernel, n_linear=n_linear, activation=activation)

    flat_wb = []
    for w, b in zip(ws, bs):
        flat_wb += [w, b]

    out = pl.pallas_call(
        kernel,
        out_shape=jax.ShapeDtypeStruct((b_pad, num_classes), jnp.float32),
        grid_spec=pltpu.PrefetchScalarGridSpec(
            num_scalar_prefetch=0,
            grid=grid,
            in_specs=in_specs,
            out_specs=out_specs,
        ),
        compiler_params=pltpu.CompilerParams(
            # batch tiles are independent -> shard across TensorCores on v7x
            dimension_semantics=("parallel",),
        ),
    )(x_bf16, *flat_wb)

    return out[:B]


def mlp_reference(x, params, activation="relu"):
    """Plain-JAX reference with the same bf16/f32 precision path as the kernel."""
    act = {"relu": jax.nn.relu, "sigmoid": jax.nn.sigmoid}[activation]
    n = len(params)
    h = x.astype(jnp.bfloat16)
    for li, (W, b) in enumerate(params):
        w = jnp.asarray(W).T.astype(jnp.bfloat16)
        h = jnp.dot(h, w, preferred_element_type=jnp.float32)
        h = h + jnp.asarray(b)[None, :].astype(jnp.float32)
        if li < n - 1:
            h = act(h).astype(jnp.bfloat16)
    return h


def init_params(key, num_channels, num_classes):
    """PyTorch nn.Linear default init: uniform(+-1/sqrt(fan_in)) for W and b."""
    dims = list(num_channels) + [num_classes]
    keys = jax.random.split(key, 2 * (len(dims) - 1))
    params = []
    for li in range(len(dims) - 1):
        fan_in, fan_out = dims[li], dims[li + 1]
        bound = 1.0 / (fan_in ** 0.5)
        W = jax.random.uniform(keys[2 * li], (fan_out, fan_in), jnp.float32,
                               minval=-bound, maxval=bound)
        b = jax.random.uniform(keys[2 * li + 1], (fan_out,), jnp.float32,
                               minval=-bound, maxval=bound)
        params.append((W, b))
    return params


if __name__ == "__main__":
    key = jax.random.PRNGKey(0)
    k_x, k_x2, k_p = jax.random.split(key, 3)

    # MyFullyConnectedNN(num_channels=[64, 32, 16], num_classes=10), default ReLU.
    num_channels = (64, 32, 16)
    num_classes = 10
    params = init_params(k_p, num_channels, num_classes)

    # Small batch (single grid step).
    x_small = jax.random.normal(k_x, (8, num_channels[0]), dtype=jnp.float32)
    out_small = jax.block_until_ready(mlp_forward(x_small, params))
    ref_small = mlp_reference(x_small, params)
    assert out_small.shape == (8, num_classes)
    assert jnp.allclose(out_small, ref_small, atol=1e-4, rtol=1e-4)

    # Larger batch exercises the batch grid (2 tiles of 1024) + tail padding.
    x_big = jax.random.normal(k_x2, (1536, num_channels[0]), dtype=jnp.float32)
    out_big = jax.block_until_ready(mlp_forward(x_big, params))
    ref_big = mlp_reference(x_big, params)
    assert out_big.shape == (1536, num_classes)
    assert jnp.allclose(out_big, ref_big, atol=1e-4, rtol=1e-4)

    print("KERNEL_OK")
</pallas_src>

<mosaic_0001>
module attributes {stable_mosaic.version = 11 : i64} {
  func.func @_mlp_kernel(%arg0: i32, %arg1: memref<8x64xbf16, #tpu.memory_space<vmem>>, %arg2: memref<64x32xbf16, #tpu.memory_space<vmem>>, %arg3: memref<1x32xf32, #tpu.memory_space<vmem>>, %arg4: memref<32x16xbf16, #tpu.memory_space<vmem>>, %arg5: memref<1x16xf32, #tpu.memory_space<vmem>>, %arg6: memref<16x10xbf16, #tpu.memory_space<vmem>>, %arg7: memref<1x10xf32, #tpu.memory_space<vmem>>, %arg8: memref<8x10xf32, #tpu.memory_space<vmem>>) attributes {dimension_semantics = [#tpu.dimension_semantics<parallel>], iteration_bounds = array<i64: 1>, scalar_prefetch = 0 : i64, scratch_operands = 0 : i64, tpu.core_type = #tpu.core_type<tc>, window_params = [{transform_indices = @transform_0, window_bounds = array<i64: 8, 64>}, {pipeline_mode = #tpu.pipeline_mode<synchronous>, transform_indices = @transform_1, window_bounds = array<i64: 64, 32>}, {pipeline_mode = #tpu.pipeline_mode<synchronous>, transform_indices = @transform_2, window_bounds = array<i64: 1, 32>}, {pipeline_mode = #tpu.pipeline_mode<synchronous>, transform_indices = @transform_3, window_bounds = array<i64: 32, 16>}, {pipeline_mode = #tpu.pipeline_mode<synchronous>, transform_indices = @transform_4, window_bounds = array<i64: 1, 16>}, {pipeline_mode = #tpu.pipeline_mode<synchronous>, transform_indices = @transform_5, window_bounds = array<i64: 16, 10>}, {pipeline_mode = #tpu.pipeline_mode<synchronous>, transform_indices = @transform_6, window_bounds = array<i64: 1, 10>}, {transform_indices = @transform_7, window_bounds = array<i64: 8, 10>}]} {
    %c0 = arith.constant 0 : index
    %c0_0 = arith.constant 0 : index
    %0 = vector.load %arg1[%c0, %c0_0] : memref<8x64xbf16, #tpu.memory_space<vmem>>, vector<8x64xbf16>
    %c0_1 = arith.constant 0 : index
    %c0_2 = arith.constant 0 : index
    %1 = vector.load %arg2[%c0_1, %c0_2] : memref<64x32xbf16, #tpu.memory_space<vmem>>, vector<64x32xbf16>
    %c0_3 = arith.constant 0 : index
    %c0_4 = arith.constant 0 : index
    %2 = vector.load %arg3[%c0_3, %c0_4] : memref<1x32xf32, #tpu.memory_space<vmem>>, vector<1x32xf32>
    %cst = arith.constant dense<0.000000e+00> : vector<8x32xf32>
    %3 = tpu.matmul %0, %1, %cst {dimension_numbers = #tpu.dot_dimension_numbers<[1], [0], [0], [1], [0, 0, 1, 1], [], []>} : vector<8x64xbf16>, vector<64x32xbf16>, vector<8x32xf32> -> vector<8x32xf32>
    %4 = vector.broadcast %2 : vector<1x32xf32> to vector<8x32xf32>
    %5 = arith.addf %3, %4 : vector<8x32xf32>
    %cst_5 = arith.constant 0.000000e+00 : f32
    %6 = vector.broadcast %cst_5 : f32 to vector<8x32xf32>
    %7 = arith.maximumf %5, %6 : vector<8x32xf32>
    %8 = arith.truncf %7 : vector<8x32xf32> to vector<8x32xbf16>
    %c0_6 = arith.constant 0 : index
    %c0_7 = arith.constant 0 : index
    %9 = vector.load %arg4[%c0_6, %c0_7] : memref<32x16xbf16, #tpu.memory_space<vmem>>, vector<32x16xbf16>
    %c0_8 = arith.constant 0 : index
    %c0_9 = arith.constant 0 : index
    %10 = vector.load %arg5[%c0_8, %c0_9] : memref<1x16xf32, #tpu.memory_space<vmem>>, vector<1x16xf32>
    %cst_10 = arith.constant dense<0.000000e+00> : vector<8x16xf32>
    %11 = tpu.matmul %8, %9, %cst_10 {dimension_numbers = #tpu.dot_dimension_numbers<[1], [0], [0], [1], [0, 0, 1, 1], [], []>} : vector<8x32xbf16>, vector<32x16xbf16>, vector<8x16xf32> -> vector<8x16xf32>
    %12 = vector.broadcast %10 : vector<1x16xf32> to vector<8x16xf32>
    %13 = arith.addf %11, %12 : vector<8x16xf32>
    %cst_11 = arith.constant 0.000000e+00 : f32
    %14 = vector.broadcast %cst_11 : f32 to vector<8x16xf32>
    %15 = arith.maximumf %13, %14 : vector<8x16xf32>
    %16 = arith.truncf %15 : vector<8x16xf32> to vector<8x16xbf16>
    %c0_12 = arith.constant 0 : index
    %c0_13 = arith.constant 0 : index
    %17 = vector.load %arg6[%c0_12, %c0_13] : memref<16x10xbf16, #tpu.memory_space<vmem>>, vector<16x10xbf16>
    %c0_14 = arith.constant 0 : index
    %c0_15 = arith.constant 0 : index
    %18 = vector.load %arg7[%c0_14, %c0_15] : memref<1x10xf32, #tpu.memory_space<vmem>>, vector<1x10xf32>
    %cst_16 = arith.constant dense<0.000000e+00> : vector<8x10xf32>
    %19 = tpu.matmul %16, %17, %cst_16 {dimension_numbers = #tpu.dot_dimension_numbers<[1], [0], [0], [1], [0, 0, 1, 1], [], []>} : vector<8x16xbf16>, vector<16x10xbf16>, vector<8x10xf32> -> vector<8x10xf32>
    %20 = vector.broadcast %18 : vector<1x10xf32> to vector<8x10xf32>
    %21 = arith.addf %19, %20 : vector<8x10xf32>
    %c0_17 = arith.constant 0 : index
    %c0_18 = arith.constant 0 : index
    %22 = vector.load %arg8[%c0_17, %c0_18] : memref<8x10xf32, #tpu.memory_space<vmem>>, vector<8x10xf32>
    tpu.vector_store %arg8[%c0_17, %c0_18], %21 {strides = array<i32>} : memref<8x10xf32, #tpu.memory_space<vmem>>, vector<8x10xf32>,
    return
  }
  func.func @transform_0(%arg0: i32) -> (i32, i32) {
    %c0_i32 = arith.constant 0 : i32
    %c0_i32_0 = arith.constant 0 : i32
    return %arg0, %c0_i32 : i32, i32
  }
  func.func @transform_1(%arg0: i32) -> (i32, i32) {
    %c0_i32 = arith.constant 0 : i32
    %c0_i32_0 = arith.constant 0 : i32
    %c0_i32_1 = arith.constant 0 : i32
    return %c0_i32, %c0_i32_0 : i32, i32
  }
  func.func @transform_2(%arg0: i32) -> (i32, i32) {
    %c0_i32 = arith.constant 0 : i32
    %c0_i32_0 = arith.constant 0 : i32
    %c0_i32_1 = arith.constant 0 : i32
    return %c0_i32, %c0_i32_0 : i32, i32
  }
  func.func @transform_3(%arg0: i32) -> (i32, i32) {
    %c0_i32 = arith.constant 0 : i32
    %c0_i32_0 = arith.constant 0 : i32
    %c0_i32_1 = arith.constant 0 : i32
    return %c0_i32, %c0_i32_0 : i32, i32
  }
  func.func @transform_4(%arg0: i32) -> (i32, i32) {
    %c0_i32 = arith.constant 0 : i32
    %c0_i32_0 = arith.constant 0 : i32
    %c0_i32_1 = arith.constant 0 : i32
    return %c0_i32, %c0_i32_0 : i32, i32
  }
  func.func @transform_5(%arg0: i32) -> (i32, i32) {
    %c0_i32 = arith.constant 0 : i32
    %c0_i32_0 = arith.constant 0 : i32
    %c0_i32_1 = arith.constant 0 : i32
    return %c0_i32, %c0_i32_0 : i32, i32
  }
  func.func @transform_6(%arg0: i32) -> (i32, i32) {
    %c0_i32 = arith.constant 0 : i32
    %c0_i32_0 = arith.constant 0 : i32
    %c0_i32_1 = arith.constant 0 : i32
    return %c0_i32, %c0_i32_0 : i32, i32
  }
  func.func @transform_7(%arg0: i32) -> (i32, i32) {
    %c0_i32 = arith.constant 0 : i32
    %c0_i32_0 = arith.constant 0 : i32
    return %arg0, %c0_i32 : i32, i32
  }
}

</mosaic_0001>

<bundles_post_ra>
// kernel: tpu_custom_call.1
= control target key start
LH: loop header
LB: loop body
LE: loop exit
PB: predicated region body
PF: predicated region fallthrough
CT: control target
= control target key end

     0   :  { %s315_s0 = inlined_call_operand.vmem [shape: bf16[8,64], index: 0, kind: input, shape index: {}]   ;;  %s316_s1 = inlined_call_operand.vmem [shape: bf16[64,32], index: 1, kind: input, shape index: {}]   ;;  %s317_s2 = inlined_call_operand.vmem [shape: f32[1,32], index: 2, kind: input, shape index: {}]   ;;  %s318_s3 = inlined_call_operand.vmem [shape: bf16[32,16], index: 3, kind: input, shape index: {}]   ;;  %s319_s4 = inlined_call_operand.vmem [shape: f32[1,16], index: 4, kind: input, shape index: {}]   ;;  %s320_s5 = inlined_call_operand.vmem [shape: bf16[16,10], index: 5, kind: input, shape index: {}]   ;;  %s321_s6 = inlined_call_operand.vmem [shape: f32[1,10], index: 6, kind: input, shape index: {}]   ;;  %s322_s7 = inlined_call_operand.hbm [shape: f32[8,10], index: 7, kind: output, shape index: {}]  }
   0x1   :  { %v204_v0 = vld [vmem:[%s316_s1 + $0x18] sm:$0xff]  ;;  %v203_v1 = vld [vmem:[%s316_s1 + $0x10] sm:$0xff] }
   0x2   :  { %73 = vmatpush.bf16.msra.mxu0 %v204_v0 }
   0x3   :  { %12 = vsyncpa [#allocation3], 0  ;;  %v202_v2 = vld [vmem:[%s316_s1 + $0x8] sm:$0xff]  ;;  %v201_v3 = vld [vmem:[%s316_s1] sm:$0xff]  ;;  %vm65_vm0 = vcmask 523264   ;;  %vm104_vm1 = vcmask 261120  }
   0x4   :  { %v28_v4 = vld [vmem:[%s315_s0] sm:$0xf]  ;;  %v206_v5 = vld [vmem:[%s318_s3 + $0x8] sm:$0xff]  ;;  %vm135_vm2 = vcmask 130048   ;;  %s238_s19 = smov [#allocation2]   ;;  %s161_s22 = sshll.u32 %s322_s7, 4  ;;  %s162_s22 = int_to_ptr.hbm [resolvable:$true] %s161_s22 }
   0x5   :  { %114 = vmatpush.bf16.msra.mxu1 %v206_v5  ;;  %v205_v6 = vld [vmem:[%s318_s3] sm:$0xff]  ;;  %s159_s20 = sshll.u32 %s238_s19, 4  ;;  %vm152_vm3 = vcmask 80896   ;;  %s160_s20 = int_to_ptr.vmem [resolvable:$true] %s159_s20 }
   0x6   :  { %74 = vmatpush.bf16.msra.mxu0 %v203_v1  ;;  %v209_v7 = vld [vmem:[%s317_s2] ss:$0 sm:$0xff] }
   0x7   :  { %v207_v13 = vld [vmem:[%s320_s5] sm:$0xff] }
   0x8   :  { %146 = vmatpush.bf16.msra.mxu2 %v207_v13  ;;  %v210_v14 = vld [vmem:[%s319_s4] ss:$0 sm:$0xff] }
   0x9   :  { %115 = vmatpush.bf16.msra.mxu1 %v205_v6  ;;  %v211_v20 = vld [vmem:[%s321_s6] ss:$0 sm:$0xff] }
   0xa   :  { %75 = vmatpush.bf16.msra.mxu0 %v202_v2 }
   0xe   :  { %76 = vmatpush.bf16.msra.mxu0 %v201_v3 }
  0x11   :  { %186 = vmatmul.msk.bf16.vlgmr.msra.gmra.mxu0 %vm65_vm0, %v28_v4 }
  0x8e   :  { %v78_v8 = vpop.f32.mrf.mxu0 }
  0x8f   :  { %v79_v9 = vadd.f32 %v209_v7, %v78_v8 }
  0x91   :  { %v82_v10 = vmax.f32 %v79_v9, 0.0 }
  0x93   :  { %v83_v11 = vpack.c.bf16 %v82_v10, %v82_v10 }
  0x95   :  { %195 = vmatmul.msk.bf16.vlgmr.msra.gmra.mxu1 %vm104_vm1, %v83_v11 }
  0x96   :  { %v80_v12 = vpop.f32.mrf.mxu0 }
 0x112   :  { %v117_v15 = vpop.f32.mrf.mxu1 }
 0x113   :  { %v118_v16 = vadd.f32 %v210_v14, %v117_v15 }
 0x115   :  { %v121_v17 = vmax.f32 %v118_v16, 0.0 }
 0x117   :  { %v122_v18 = vpack.c.bf16 %v121_v17, %v121_v17 }
 0x119   :  { %200 = vmatmul.msk.bf16.vlgmr.msra.gmra.mxu2 %vm135_vm2, %v122_v18 }
 0x11a   :  { %v119_v19 = vpop.f32.mrf.mxu1 }
 0x19c   :  { %v148_v21 = vpop.f32.mrf.mxu2 }
 0x19d   :  { %v149_v22 = vadd.f32 %v211_v20, %v148_v21 }
 0x19f   :  { %153 = vst.msk [vmem:[#allocation2] sm:$0xff] %vm152_vm3, %v149_v22 }
 0x1a0   :  { %164 = dma.vmem_to_hbm [thread:$0]  %s160_s20, 128, %s162_s22, [#allocation3]  }
 0x1a4   :  { %v150_v23 = vpop.f32.mrf.mxu2 }
 0x1a5   :  { %236 = dma.done.wait [#allocation3], 128  }
 0x1a6   :  { %237 = vsyncadd [#allocation3], 4294967168 }
 0x1a7   :  { %169 = vsyncpa [#allocation3], 1 }

</bundles_post_ra>
